<compile_context>
chip_gen: v7x
topology: tpu7x:2x2x1
jax: 0.10.0
libtpu: 0.0.40
codegen_flags: <defaults>
</compile_context>

<pallas_src>
import functools

import jax
import jax.numpy as jnp
from jax.experimental import pallas as pl
from jax.experimental.pallas import tpu as pltpu


# --------------------------------------------------------------------------
# Kernel: per-row NLL via online logsumexp over class tiles.
# Grid = (batch tiles ["parallel"], class tiles ["arbitrary", reduction]).
# --------------------------------------------------------------------------
def _ce_nll_kernel(logits_ref, targets_ref, nll_ref, m_sc, l_sc, t_sc,
                   *, n_total, c_total, tile_n, tile_c):
    i = pl.program_id(0)            # batch-tile index
    j = pl.program_id(1)            # class-tile index (reduction, innermost)
    nc = pl.num_programs(1)

    @pl.when(j == 0)
    def _init():
        m_sc[...] = jnp.full_like(m_sc, -jnp.inf)   # running max
        l_sc[...] = jnp.zeros_like(l_sc)            # running sum(exp(x - m))
        t_sc[...] = jnp.zeros_like(t_sc)            # target logit

    logits = logits_ref[...].astype(jnp.float32)    # (tile_n, tile_c) f32
    targets = targets_ref[...]                      # (tile_n, 1) int32

    cls_idx = j * tile_c + jax.lax.broadcasted_iota(jnp.int32, logits.shape, 1)
    if c_total % tile_c != 0:
        # Last class tile is padded: exclude padded columns from max / sumexp.
        logits_v = jnp.where(cls_idx < c_total, logits, -jnp.inf)
    else:
        logits_v = logits

    # Online logsumexp update for this class tile.
    m_tile = jnp.max(logits_v, axis=-1, keepdims=True)
    m_new = jnp.maximum(m_sc[...], m_tile)
    alpha = jnp.exp(m_sc[...] - m_new)
    l_sc[...] = alpha * l_sc[...] + jnp.sum(jnp.exp(logits_v - m_new),
                                            axis=-1, keepdims=True)
    m_sc[...] = m_new
    # Target logit (targets < C, so they never hit padded class columns).
    t_sc[...] += jnp.sum(jnp.where(cls_idx == targets, logits, 0.0),
                         axis=-1, keepdims=True)

    @pl.when(j == nc - 1)
    def _finalize():
        # nll = -log_softmax(x)[target] = m + log(sum exp(x - m)) - x[target]
        nll = m_sc[...] + jnp.log(l_sc[...]) - t_sc[...]
        # Mask rows past the true batch size (padded last batch tile).
        row_idx = i * tile_n + jax.lax.broadcasted_iota(jnp.int32, (tile_n, 1), 0)
        nll_ref[...] = jnp.where(row_idx < n_total, nll, 0.0)


# --------------------------------------------------------------------------
# Tile sizing: derived from C and a per-generation VMEM budget.
# --------------------------------------------------------------------------
def _auto_tiles(n, c, itemsize):
    try:
        vmem_cap = int(getattr(pltpu.get_tpu_info(), "vmem_capacity_bytes", 0))
    except Exception:
        vmem_cap = 0
    if vmem_cap <= 0:
        vmem_cap = 64 << 20                       # conservative: v7x per-TC VMEM
    # Budget for the double-buffered logits block: ~1/4 of VMEM, clamped to
    # [2 MiB, 16 MiB] (headroom for targets/output/scratch, esp. on v7x).
    budget = max(2 << 20, min(vmem_cap // 4, 16 << 20))

    rows_full_c = budget // (2 * c * itemsize)    # rows if full C is one block
    if c <= 128 or rows_full_c >= 256:
        tile_c = c
        tile_n = min(1024, rows_full_c)           # 512+ rows ~85% of HBM roofline
    else:
        # Vocab-scale C: tile classes so tile_n can stay big enough to
        # amortize the per-grid-step overhead.
        tile_n = 256
        tile_c = (budget // (2 * tile_n * itemsize)) // 128 * 128
    return tile_n, tile_c


def _round_tiles(n, c, tile_n, tile_c):
    # Batch tile: multiple of 8 (sublane) or the full batch.
    tile_n = n if tile_n >= n else min(n, max(8, (tile_n // 8) * 8))
    # Class tile: multiple of 128 (lane) or the full class dim.
    tile_c = c if tile_c >= c else max(128, (tile_c // 128) * 128)
    if tile_c > c:
        tile_c = c
    return tile_n, tile_c


# --------------------------------------------------------------------------
# Wrapper: Pallas cross-entropy + plain-JAX aux criterions.
# --------------------------------------------------------------------------
def cross_entropy_pallas(logits, targets, *, tile_n=None, tile_c=None):
    n, c = logits.shape
    itemsize = jnp.dtype(logits.dtype).itemsize

    if tile_n is None or tile_c is None:
        auto_n, auto_c = _auto_tiles(n, c, itemsize)
        tile_n = auto_n if tile_n is None else tile_n
        tile_c = auto_c if tile_c is None else tile_c
    tile_n, tile_c = _round_tiles(n, c, tile_n, tile_c)

    num_n = pl.cdiv(n, tile_n)
    num_c = pl.cdiv(c, tile_c)

    # Explicit VMEM limit: double-buffered logits block + headroom (never below
    # the 32 MiB scoped default, never above physical capacity on any gen).
    block_bytes = 2 * tile_n * tile_c * itemsize
    vmem_limit = int(min(64 << 20, max(32 << 20, block_bytes + (8 << 20))))

    targets2d = targets.reshape(n, 1).astype(jnp.int32)
    kernel = functools.partial(_ce_nll_kernel, n_total=n, c_total=c,
                               tile_n=tile_n, tile_c=tile_c)

    nll = pl.pallas_call(
        kernel,
        out_shape=jax.ShapeDtypeStruct((n, 1), jnp.float32),
        grid_spec=pltpu.PrefetchScalarGridSpec(
            num_scalar_prefetch=0,
            grid=(num_n, num_c),
            in_specs=[
                pl.BlockSpec((tile_n, tile_c), lambda i, j: (i, j)),  # logits
                pl.BlockSpec((tile_n, 1), lambda i, j: (i, 0)),       # targets
            ],
            out_specs=pl.BlockSpec((tile_n, 1), lambda i, j: (i, 0)), # per-row NLL
            scratch_shapes=[pltpu.VMEM((tile_n, 1), jnp.float32)] * 3,
        ),
        compiler_params=pltpu.CompilerParams(
            dimension_semantics=("parallel", "arbitrary"),
            vmem_limit_bytes=vmem_limit),
    )(logits, targets2d)

    return jnp.mean(nll)   # tiny (N,1) vector; XLA reduce is negligible


def multiple_loss(logits, targets, aux_criterions=(), *, tile_n=None, tile_c=None):
    """MultipleLoss.forward: CE(outputs, targets) + sum(criterion() for aux)."""
    loss = cross_entropy_pallas(logits, targets, tile_n=tile_n, tile_c=tile_c)
    for criterion in aux_criterions:
        loss = loss + criterion()
    return loss


# --------------------------------------------------------------------------
# Pure-JAX reference.
# --------------------------------------------------------------------------
def _reference(logits, targets, aux_criterions):
    logp = jax.nn.log_softmax(logits.astype(jnp.float32), axis=-1)
    nll = -jnp.take_along_axis(logp, targets[:, None], axis=-1)[:, 0]
    loss = jnp.mean(nll)
    for criterion in aux_criterions:
        loss = loss + criterion()
    return loss


if __name__ == "__main__":
    key = jax.random.PRNGKey(0)
    k_logits, k_targets, k_w1, k_w2 = jax.random.split(key, 4)

    # batch=12 (exercises the padded last batch tile with tile_n=8),
    # classes=256 with tile_c=128 (exercises the online-logsumexp class
    # tiling): grid = (2 batch tiles, 2 class tiles).
    N, C = 12, 256
    logits = (jax.random.normal(k_logits, (N, C), dtype=jnp.float32)
              .astype(jnp.bfloat16))   # bf16 in HBM halves DMA bytes (v5e/v6e)
    targets = jax.random.randint(k_targets, (N,), 0, C, dtype=jnp.int32)

    # No-arg aux criterions (deterministic weight regularizers), evaluated in
    # plain JAX by the wrapper -- exactly `loss += criterion()`.
    w1 = jax.random.normal(k_w1, (8, 128), dtype=jnp.float32) * 0.1
    w2 = jax.random.normal(k_w2, (8, 128), dtype=jnp.float32) * 0.1
    aux_criterions = (lambda: 0.5 * jnp.mean(w1 * w1),
                      lambda: jnp.mean(jnp.abs(w2)))

    loss = multiple_loss(logits, targets, aux_criterions, tile_n=8, tile_c=128)
    loss = jax.block_until_ready(loss)

    ref = _reference(logits, targets, aux_criterions)
    assert jnp.allclose(loss, ref, atol=1e-4, rtol=1e-4), (loss, ref)

    print("KERNEL_OK")
</pallas_src>

<mosaic_0001>
module attributes {stable_mosaic.version = 11 : i64} {
  func.func @_ce_nll_kernel(%arg0: i32, %arg1: i32, %arg2: memref<8x128xbf16, #tpu.memory_space<vmem>>, %arg3: memref<8x1xi32, #tpu.memory_space<vmem>>, %arg4: memref<8x1xf32, #tpu.memory_space<vmem>>, %arg5: memref<8x1xf32, #tpu.memory_space<vmem>>, %arg6: memref<8x1xf32, #tpu.memory_space<vmem>>, %arg7: memref<8x1xf32, #tpu.memory_space<vmem>>) attributes {dimension_semantics = [#tpu.dimension_semantics<parallel>, #tpu.dimension_semantics<arbitrary>], iteration_bounds = array<i64: 2, 2>, scalar_prefetch = 0 : i64, scratch_operands = 3 : i64, tpu.core_type = #tpu.core_type<tc>, window_params = [{transform_indices = @transform_0, window_bounds = array<i64: 8, 128>}, {transform_indices = @transform_1, window_bounds = array<i64: 8, 1>}, {transform_indices = @transform_2, window_bounds = array<i64: 8, 1>}]} {
    %c0_i32 = arith.constant 0 : i32
    %0 = arith.cmpi eq, %arg1, %c0_i32 : i32
    %1 = arith.extui %0 : i1 to i32
    %c0_i32_0 = arith.constant 0 : i32
    %2 = arith.cmpi ne, %1, %c0_i32_0 : i32
    scf.if %2 {
      %cst_22 = arith.constant 0xFF800000 : f32
      %39 = vector.broadcast %cst_22 : f32 to vector<8x1xf32>
      %c0_23 = arith.constant 0 : index
      %c0_24 = arith.constant 0 : index
      %40 = vector.load %arg5[%c0_23, %c0_24] : memref<8x1xf32, #tpu.memory_space<vmem>>, vector<8x1xf32>
      tpu.vector_store %arg5[%c0_23, %c0_24], %39 {strides = array<i32>} : memref<8x1xf32, #tpu.memory_space<vmem>>, vector<8x1xf32>,
      %cst_25 = arith.constant 0.000000e+00 : f32
      %41 = vector.broadcast %cst_25 : f32 to vector<8x1xf32>
      %c0_26 = arith.constant 0 : index
      %c0_27 = arith.constant 0 : index
      %42 = vector.load %arg6[%c0_26, %c0_27] : memref<8x1xf32, #tpu.memory_space<vmem>>, vector<8x1xf32>
      tpu.vector_store %arg6[%c0_26, %c0_27], %41 {strides = array<i32>} : memref<8x1xf32, #tpu.memory_space<vmem>>, vector<8x1xf32>,
      %cst_28 = arith.constant 0.000000e+00 : f32
      %43 = vector.broadcast %cst_28 : f32 to vector<8x1xf32>
      %c0_29 = arith.constant 0 : index
      %c0_30 = arith.constant 0 : index
      %44 = vector.load %arg7[%c0_29, %c0_30] : memref<8x1xf32, #tpu.memory_space<vmem>>, vector<8x1xf32>
      tpu.vector_store %arg7[%c0_29, %c0_30], %43 {strides = array<i32>} : memref<8x1xf32, #tpu.memory_space<vmem>>, vector<8x1xf32>,
    } else {
    }
    %c0 = arith.constant 0 : index
    %c0_1 = arith.constant 0 : index
    %3 = vector.load %arg2[%c0, %c0_1] : memref<8x128xbf16, #tpu.memory_space<vmem>>, vector<8x128xbf16>
    %4 = arith.extf %3 : vector<8x128xbf16> to vector<8x128xf32>
    %c0_2 = arith.constant 0 : index
    %c0_3 = arith.constant 0 : index
    %5 = vector.load %arg3[%c0_2, %c0_3] : memref<8x1xi32, #tpu.memory_space<vmem>>, vector<8x1xi32>
    %c128_i32 = arith.constant 128 : i32
    %6 = arith.muli %arg1, %c128_i32 : i32
    %7 = tpu.iota {dimensions = array<i32: 1>} : vector<8x128xi32>
    %8 = vector.broadcast %6 : i32 to vector<8x128xi32>
    %9 = arith.addi %8, %7 : vector<8x128xi32>
    %cst = arith.constant dense<0xFF800000> : vector<8xf32>
    %10 = vector.multi_reduction <maximumf>, %4, %cst [1] : vector<8x128xf32> to vector<8xf32>
    %11 = vector.shape_cast %10 : vector<8xf32> to vector<8x1xf32>
    %c0_4 = arith.constant 0 : index
    %c0_5 = arith.constant 0 : index
    %12 = vector.load %arg5[%c0_4, %c0_5] : memref<8x1xf32, #tpu.memory_space<vmem>>, vector<8x1xf32>
    %13 = arith.maximumf %12, %11 : vector<8x1xf32>
    %c0_6 = arith.constant 0 : index
    %c0_7 = arith.constant 0 : index
    %14 = vector.load %arg5[%c0_6, %c0_7] : memref<8x1xf32, #tpu.memory_space<vmem>>, vector<8x1xf32>
    %15 = arith.subf %14, %13 : vector<8x1xf32>
    %16 = math.exp %15 : vector<8x1xf32>
    %c0_8 = arith.constant 0 : index
    %c0_9 = arith.constant 0 : index
    %17 = vector.load %arg6[%c0_8, %c0_9] : memref<8x1xf32, #tpu.memory_space<vmem>>, vector<8x1xf32>
    %18 = arith.mulf %16, %17 : vector<8x1xf32>
    %19 = vector.broadcast %13 : vector<8x1xf32> to vector<8x128xf32>
    %20 = arith.subf %4, %19 : vector<8x128xf32>
    %21 = math.exp %20 : vector<8x128xf32>
    %cst_10 = arith.constant dense<0.000000e+00> : vector<8xf32>
    %22 = vector.multi_reduction <add>, %21, %cst_10 [1] : vector<8x128xf32> to vector<8xf32>
    %23 = vector.shape_cast %22 : vector<8xf32> to vector<8x1xf32>
    %24 = arith.addf %18, %23 : vector<8x1xf32>
    %c0_11 = arith.constant 0 : index
    %c0_12 = arith.constant 0 : index
    %25 = vector.load %arg6[%c0_11, %c0_12] : memref<8x1xf32, #tpu.memory_space<vmem>>, vector<8x1xf32>
    tpu.vector_store %arg6[%c0_11, %c0_12], %24 {strides = array<i32>} : memref<8x1xf32, #tpu.memory_space<vmem>>, vector<8x1xf32>,
    %c0_13 = arith.constant 0 : index
    %c0_14 = arith.constant 0 : index
    %26 = vector.load %arg5[%c0_13, %c0_14] : memref<8x1xf32, #tpu.memory_space<vmem>>, vector<8x1xf32>
    tpu.vector_store %arg5[%c0_13, %c0_14], %13 {strides = array<i32>} : memref<8x1xf32, #tpu.memory_space<vmem>>, vector<8x1xf32>,
    %c0_15 = arith.constant 0 : index
    %c0_16 = arith.constant 0 : index
    %27 = vector.load %arg7[%c0_15, %c0_16] : memref<8x1xf32, #tpu.memory_space<vmem>>, vector<8x1xf32>
    %28 = vector.broadcast %5 : vector<8x1xi32> to vector<8x128xi32>
    %29 = arith.cmpi eq, %9, %28 : vector<8x128xi32>
    %cst_17 = arith.constant 0.000000e+00 : f32
    %30 = vector.broadcast %cst_17 : f32 to vector<8x128xf32>
    %31 = arith.select %29, %4, %30 : vector<8x128xi1>, vector<8x128xf32>
    %cst_18 = arith.constant dense<0.000000e+00> : vector<8xf32>
    %32 = vector.multi_reduction <add>, %31, %cst_18 [1] : vector<8x128xf32> to vector<8xf32>
    %33 = vector.shape_cast %32 : vector<8xf32> to vector<8x1xf32>
    %34 = arith.addf %27, %33 : vector<8x1xf32>
    %c0_19 = arith.constant 0 : index
    %c0_20 = arith.constant 0 : index
    %35 = vector.load %arg7[%c0_19, %c0_20] : memref<8x1xf32, #tpu.memory_space<vmem>>, vector<8x1xf32>
    tpu.vector_store %arg7[%c0_19, %c0_20], %34 {strides = array<i32>} : memref<8x1xf32, #tpu.memory_space<vmem>>, vector<8x1xf32>,
    %c1_i32 = arith.constant 1 : i32
    %36 = arith.cmpi eq, %arg1, %c1_i32 : i32
    %37 = arith.extui %36 : i1 to i32
    %c0_i32_21 = arith.constant 0 : i32
    %38 = arith.cmpi ne, %37, %c0_i32_21 : i32
    scf.if %38 {
      %c0_22 = arith.constant 0 : index
      %c0_23 = arith.constant 0 : index
      %39 = vector.load %arg5[%c0_22, %c0_23] : memref<8x1xf32, #tpu.memory_space<vmem>>, vector<8x1xf32>
      %c0_24 = arith.constant 0 : index
      %c0_25 = arith.constant 0 : index
      %40 = vector.load %arg6[%c0_24, %c0_25] : memref<8x1xf32, #tpu.memory_space<vmem>>, vector<8x1xf32>
      %41 = math.log %40 : vector<8x1xf32>
      %42 = arith.addf %39, %41 : vector<8x1xf32>
      %c0_26 = arith.constant 0 : index
      %c0_27 = arith.constant 0 : index
      %43 = vector.load %arg7[%c0_26, %c0_27] : memref<8x1xf32, #tpu.memory_space<vmem>>, vector<8x1xf32>
      %44 = arith.subf %42, %43 : vector<8x1xf32>
      %c8_i32 = arith.constant 8 : i32
      %45 = arith.muli %arg0, %c8_i32 : i32
      %46 = tpu.iota {dimensions = array<i32: 0>} : vector<8x1xi32>
      %47 = vector.broadcast %45 : i32 to vector<8x1xi32>
      %48 = arith.addi %47, %46 : vector<8x1xi32>
      %c12_i32 = arith.constant 12 : i32
      %49 = vector.broadcast %c12_i32 : i32 to vector<8x1xi32>
      %50 = arith.cmpi slt, %48, %49 : vector<8x1xi32>
      %cst_28 = arith.constant 0.000000e+00 : f32
      %51 = vector.broadcast %cst_28 : f32 to vector<8x1xf32>
      %52 = arith.select %50, %44, %51 : vector<8x1xi1>, vector<8x1xf32>
      %c0_29 = arith.constant 0 : index
      %c0_30 = arith.constant 0 : index
      %53 = vector.load %arg4[%c0_29, %c0_30] : memref<8x1xf32, #tpu.memory_space<vmem>>, vector<8x1xf32>
      tpu.vector_store %arg4[%c0_29, %c0_30], %52 {strides = array<i32>} : memref<8x1xf32, #tpu.memory_space<vmem>>, vector<8x1xf32>,
    } else {
    }
    return
  }
  func.func @transform_0(%arg0: i32, %arg1: i32) -> (i32, i32) {
    %c0_i32 = arith.constant 0 : i32
    return %arg0, %arg1 : i32, i32
  }
  func.func @transform_1(%arg0: i32, %arg1: i32) -> (i32, i32) {
    %c0_i32 = arith.constant 0 : i32
    %c0_i32_0 = arith.constant 0 : i32
    return %arg0, %c0_i32 : i32, i32
  }
  func.func @transform_2(%arg0: i32, %arg1: i32) -> (i32, i32) {
    %c0_i32 = arith.constant 0 : i32
    %c0_i32_0 = arith.constant 0 : i32
    return %arg0, %c0_i32 : i32, i32
  }
}

</mosaic_0001>

<bundles_post_ra>
// kernel: tpu_custom_call.1
= control target key start
LH: loop header
LB: loop body
LE: loop exit
PB: predicated region body
PF: predicated region fallthrough
CT: control target
= control target key end

     0   :  { %s456_s9 = smov 0   ;;  %s458_s10 = smov 0   ;;  %s529_s0 = inlined_call_operand.vmem [shape: bf16[12,256], index: 0, kind: input, shape index: {}]   ;;  %s530_s1 = inlined_call_operand.vmem [shape: s32[12,1], index: 1, kind: input, shape index: {}]   ;;  %s531_s2 = inlined_call_operand.vmem [shape: f32[12,1], index: 2, kind: output, shape index: {}]  }
   0x1   :  { %s460_s11 = smov 0   ;;  %s462_s12 = smov 0  }
   0x2   :  { %s464_s13 = smov 0  }
   0x3 LB: > { %s21_s14 = sadd.s32 1, %s428_s11  ;;  %s24_s15 = sadd.s32 1, %s432_s12  ;;  %s436_s13 = sphi %s464_s13, %s12_s13   ;;  %s432_s12 = sphi %s462_s12, %s535_s12   ;;  %s428_s11 = sphi %s460_s11, %s534_s11   ;;  %s424_s10 = sphi %s458_s10, %s533_s10   ;;  %s420_s9 = sphi %s456_s9, %s532_s9  }
   0x4   : > { %p22_p0 = scmp.ge.s32.totalorder %s21_s14, 2  ;;  %p336_p1 = scmp.ge.s32.totalorder %s436_s13, 1 }
   0x5   : > { %p138_p2 = scmp.lt.s32.totalorder %s436_s13, 5 }
   0x6   : > { %s537_s14 = smov (%p22_p0, %s21_s14), 0  ;;  %s539_s15 = smov (!%p22_p0, %s24_s15), %s432_s12 }
   0x7   : > { %p139_p3 = pnand %p336_p1, %p138_p2  ;;  %p26_p4 = scmp.ge.s32.totalorder %s539_s15, 2 }
   0x8   : > { %p166_p5 = scmp.lt.s32.totalorder (!%p139_p3), %s424_s10, 1  ;;  %p168_p6 = scmp.lt.s32.totalorder (!%p139_p3), %s420_s9, 1 }
   0x9   : > { %s541_s15 = smov (%p26_p4, %s539_s15), 0  ;;  %142 = sbr.rel (%p139_p3) target bundleno = 489 (0x1e9), region = 28 }
   0xa   : > { %p341_p7 = scmp.ne.s32.totalorder (!%p139_p3), %s420_s9, 0 }
  0x10   : > { %s167_s16 = scalar_select %p166_p5, %s424_s10, 1 }
  0x11   : > { %s169_s17 = scalar_select %p168_p6, %s420_s9, 1 }
  0x12   : > { %s337_s18 = sshll.u32 %s167_s16, 1  ;;  %s339_s19 = sshll.u32 %s167_s16, 3  ;;  %vm186_vm0 = vcmask (!%p341_p7), 7168   ;;  %v438_v0 = vmov (!%p341_p7), -inf   ;;  %v439_v1 = vmov (!%p341_p7), 0.0  }
  0x13   : > { %s171_s20 = sadd.s32 %s337_s18, %s169_s17  ;;  %s177_s23 = scalar_lea.vmem %s530_s1, %s339_s19  ;;  %187 = vst.msk [vmem:[#allocation2] sm:$0xff] (!%p341_p7), %vm186_vm0, %v438_v0  ;;  %188 = vst.msk [vmem:[#allocation3] sm:$0xff] (!%p341_p7), %vm186_vm0, %v439_v1 }
  0x14   : > { %s338_s24 = sshll.u32 %s171_s20, 2  ;;  %s500_s27 = scalar_lea.vmem %s531_s2, %s339_s19  ;;  %189 = vst.msk [vmem:[#allocation4] sm:$0xff] (!%p341_p7), %vm186_vm0, %v439_v1 }
  0x15   : > { %s173_s30 = scalar_lea.vmem %s529_s0, %s338_s24  ;;  %185 = sbr.rel (%p341_p7) target bundleno = 28 (0x1c), region = 32 }
  0x1c PF: > { %v190_v2 = vld [vmem:[%s173_s30] sm:$0xf]  ;;  %v440_v4 = vmov 0   ;;  %vm218_vm1 = vcmask 7168   ;;  %v194_v12 = vlaneseq  ;;  %s342_s3 = sshll.u32 %s420_s9, 7  ;;  %v205_v22 = vld [vmem:[#allocation3] sm:$0xff] }
  0x1d   : > { %v191_v3 = vunpack.c.l.bf16 %v190_v2  ;;  %390 = vset.pattern.permute.xlu0 %v440_v4  ;;  %391 = vset.pattern.permute.xlu1 %v440_v4  ;;  %v192_v5 = vld [vmem:[%s177_s23] sm:$0xff]  ;;  %v196_v15 = vstv %s342_s3  ;;  %v221_v26 = vld [vmem:[#allocation4] sm:$0xff]  ;;  %p343_p8 = scmp.ne.s32.totalorder %s420_s9, 1 }
  0x1e   : > { %223 = vperm.xlu1 %391, %v192_v5   ;;  %v200_v6 = vld [vmem:[#allocation2] sm:$0xff]  ;;  %v195_v14 = vand.u32 127, %v194_v12  ;;  %s344_s4 = sshll.u32 (!%p343_p8), %s424_s10, 3  ;;  %v244_v30 = vshrl.u32 (!%p343_p8), %v194_v12, 7 }
  0x1f   : > { %198 = vmax.xlane.f32.xlu0 %v191_v3  ;;  %v245_v31 = vstv (!%p343_p8), %s344_s4 }
  0x20   : > { %v197_v16 = vadd.s32 %v196_v15, %v195_v14  ;;  %v246_v34 = vadd.s32 (!%p343_p8), %v245_v31, %v244_v30 }
  0x22   : > { %vm247_vm3 = vcmp.lt.s32.totalorder (!%p343_p8), %v246_v34, 12 }
  0x9d   : > { %v224_v17 = vpop.permute.xlu1 %223 }
  0x9e   : > { %vm225_vm2 = vcmp.eq.s32.totalorder %v197_v16, %v224_v17 }
  0x9f   : > { %v226_v19 = vsel %vm225_vm2, %v191_v3, 0.0 }
  0xac   : > { %v199_v7 = vpop.xlane.xlu0 %198 }
  0xad   : > { %v201_v8 = vmax.f32 %v200_v6, %v199_v7 }
  0xaf   : > { %v202_v9 = vsub.f32 %v200_v6, %v201_v8  ;;  %220 = vst.msk [vmem:[#allocation2] sm:$0xff] %vm218_vm1, %v201_v8  ;;  %209 = vperm.xlu0 %390, %v201_v8  }
  0xb1   : > { %v203_v20 = vmul.f32 1.442695, %v202_v9 }
  0xb6   : > { %v235_v33 = vld [vmem:[#allocation2] sm:$0xff] (!%p343_p8) }
 0x12e   : > { %v210_v10 = vpop.permute.xlu0 %209 }
 0x12f   : > { %v212_v11 = vsub.f32 %v191_v3, %v210_v10 }
 0x131   : > { %v213_v13 = vmul.f32 1.442695, %v212_v11 }
 0x133   : > { %392 = vpow2.f32 %v213_v13 }
 0x134   : > { %394 = vpow2.f32 %v203_v20 }
 0x13d   : > { %v393_v18 = vpop.eup %392 }
 0x13e   : > { %215 = vadd.xlane.f32.xlu1 %v393_v18  ;;  %v395_v21 = vpop.eup %394 }
 0x13f   : > { %v206_v23 = vmul.f32 %v395_v21, %v205_v22 }
 0x142   : > { %227 = vadd.xlane.f32.xlu1 %v226_v19 }
 0x1cb   : > { %v216_v24 = vpop.xlane.xlu1 %215 }
 0x1cc   : > { %v217_v25 = vadd.f32 %v216_v24, %v206_v23  ;;  %234 = sbr.rel (%p343_p8) target bundleno = 489 (0x1e9), region = 36 }
 0x1ce   : > { %219 = vst.msk [vmem:[#allocation3] sm:$0xff] %vm218_vm1, %v217_v25 }
 0x1cf   : > { %v228_v27 = vpop.xlane.xlu1 %227 }
 0x1d0   : > { %v229_v28 = vadd.f32 %v228_v27, %v221_v26 }
 0x1d2   : > { %230 = vst.msk [vmem:[#allocation4] sm:$0xff] %vm218_vm1, %v229_v28 }
 0x1d5   : > { %v236_v29 = vld [vmem:[#allocation3] sm:$0xff] }
 0x1d6   : > { %396 = vlog2.f32 %v236_v29 }
 0x1d9   : > { %v240_v36 = vld [vmem:[#allocation4] sm:$0xff] }
 0x1e0   : > { %v397_v32 = vpop.eup %396 }
 0x1e1   : > { %v238_v35 = vmul.f32 0.6931472, %v397_v32 }
 0x1e3   : > { %v239_v37 = vadd.f32 %v238_v35, %v235_v33 }
 0x1e5   : > { %v241_v38 = vsub.f32 %v239_v37, %v240_v36 }
 0x1e7   : > { %v248_v39 = vsel %vm247_vm3, %v241_v38, 0.0 }
 0x1e8   : > { %249 = vst.msk [vmem:[%s500_s27] sm:$0xff] %vm218_vm1, %v248_v39 }
 0x1e9 PF: > { %s12_s13 = sadd.s32 1, %s436_s13   ;;  %s532_s9 = smov %s428_s11 }
 0x1ea   : > { %p9_p9 = scmp.ge.s32.totalorder %s12_s13, 6   ;;  %s533_s10 = smov %s432_s12 }
 0x1eb   : > { %s534_s11 = smov %s537_s14  ;;  %s535_s12 = smov %s541_s15 }
 0x1ec   :  { %11 = sbr.rel (!%p9_p9) target bundleno = 3 (0x3), region = 69 }

</bundles_post_ra>
